<compile_context>
chip_gen: v7x
topology: tpu7x:2x2x1
jax: 0.10.0
libtpu: 0.0.40
codegen_flags: <defaults>
</compile_context>

<pallas_src>
import jax
import jax.numpy as jnp
from jax.experimental import pallas as pl
from jax.experimental.pallas import tpu as pltpu


def _feature_head_kernel(x_ref, w8_ref, b8_ref, m8_ref,
                         w9_ref, b9_ref, m9_ref, o_ref, acc_ref):
    # grid = (m_blocks, k_tiles); axis 1 is the fc8 reduction axis.
    k = pl.program_id(1)

    @pl.when(k == 0)
    def _init():
        acc_ref[...] = jnp.zeros_like(acc_ref)

    # fc8 partial product for this K tile: bf16 inputs, f32 accumulation (MXU).
    acc_ref[...] += jnp.dot(x_ref[...], w8_ref[...],
                            preferred_element_type=jnp.float32)

    @pl.when(k == pl.num_programs(1) - 1)
    def _finalize():
        # fc8 epilogue: bias -> dropout (pre-scaled keep mask) -> relu
        h = acc_ref[...] + b8_ref[...]            # (bm, R) + (1, R)
        h = jnp.maximum(h * m8_ref[...], 0.0)     # relu(dropout(fc8(x)))

        # fc9 (weight is small: R x R) -> bias -> dropout -> relu
        y = jnp.dot(h.astype(jnp.bfloat16), w9_ref[...],
                    preferred_element_type=jnp.float32)
        y = y + b9_ref[...]
        o_ref[...] = jnp.maximum(y * m9_ref[...], 0.0).astype(o_ref.dtype)


def feature_head_forward(x, params, key):
    """x: (B, C, H, W) -> (B, representation_size), training-mode dropout."""
    B = x.shape[0]
    x2d = x.reshape(B, -1)
    Din = x2d.shape[1]
    R = params["w8"].shape[1]

    # Dropout p=0.5, training=True (matches F.dropout defaults in the module).
    # Keep-mask already scaled by 1/(1-p) = 2 so the kernel only multiplies.
    k8, k9 = jax.random.split(key)
    m8 = jax.random.bernoulli(k8, 0.5, (B, R)).astype(jnp.float32) * 2.0
    m9 = jax.random.bernoulli(k9, 0.5, (B, R)).astype(jnp.float32) * 2.0

    # bf16 streaming of matmul operands; biases / masks stay f32.
    xb = x2d.astype(jnp.bfloat16)
    w8 = params["w8"].astype(jnp.bfloat16)
    w9 = params["w9"].astype(jnp.bfloat16)
    b8 = params["b8"].astype(jnp.float32)
    b9 = params["b9"].astype(jnp.float32)

    # K tiling of fc8's reduction dim (largest clean tile; falls back to full).
    tk = next((t for t in (512, 256, 128) if Din % t == 0), Din)
    kt = Din // tk
    # Row (M) tiling: parallel axis; keep the full batch if it is small.
    bm = 128 if (B % 128 == 0) else B
    mt = B // bm

    return pl.pallas_call(
        _feature_head_kernel,
        out_shape=jax.ShapeDtypeStruct((B, R), jnp.float32),
        grid_spec=pltpu.PrefetchScalarGridSpec(
            num_scalar_prefetch=0,
            grid=(mt, kt),
            in_specs=[
                pl.BlockSpec((bm, tk), lambda m, k: (m, k)),   # x tile
                pl.BlockSpec((tk, R), lambda m, k: (k, 0)),    # w8 tile
                pl.BlockSpec((1, R), lambda m, k: (0, 0)),     # b8
                pl.BlockSpec((bm, R), lambda m, k: (m, 0)),    # dropout mask 8
                pl.BlockSpec((R, R), lambda m, k: (0, 0)),     # w9 (resident)
                pl.BlockSpec((1, R), lambda m, k: (0, 0)),     # b9
                pl.BlockSpec((bm, R), lambda m, k: (m, 0)),    # dropout mask 9
            ],
            out_specs=pl.BlockSpec((bm, R), lambda m, k: (m, 0)),
            scratch_shapes=[pltpu.VMEM((bm, R), jnp.float32)],  # fc8 accumulator
        ),
        compiler_params=pltpu.CompilerParams(
            dimension_semantics=("parallel", "arbitrary")),
    )(xb, w8, b8, m8, w9, b9, m9)


def init_feature_head_params(key, in_channels, representation_size):
    """Deterministic params mimicking nn.Linear's default uniform init.

    Weights are stored transposed: (in_features, out_features)."""
    k1, k2, k3, k4 = jax.random.split(key, 4)
    bound8 = 1.0 / jnp.sqrt(in_channels)
    bound9 = 1.0 / jnp.sqrt(representation_size)
    w8 = jax.random.uniform(k1, (in_channels, representation_size),
                            jnp.float32, -bound8, bound8)
    b8 = jax.random.uniform(k2, (1, representation_size),
                            jnp.float32, -bound8, bound8)
    w9 = jax.random.uniform(k3, (representation_size, representation_size),
                            jnp.float32, -bound9, bound9)
    b9 = jax.random.uniform(k4, (1, representation_size),
                            jnp.float32, -bound9, bound9)
    return dict(w8=w8, b8=b8, w9=w9, b9=b9)


if __name__ == "__main__":
    key = jax.random.PRNGKey(0)
    kx, kp, kd = jax.random.split(key, 3)

    # small shapes: batch=4, feature map (4, 8, 8) -> in_channels=256,
    # representation_size=128
    B, C, H, W = 4, 4, 8, 8
    in_channels = C * H * W
    representation_size = 128

    x = jax.random.normal(kx, (B, C, H, W), dtype=jnp.float32)
    params = init_feature_head_params(kp, in_channels, representation_size)

    out = feature_head_forward(x, params, kd)
    out = jax.block_until_ready(out)

    assert out.shape == (B, representation_size)
    assert bool(jnp.all(out >= 0.0))          # relu output is non-negative
    assert bool(jnp.all(jnp.isfinite(out)))
    print("KERNEL_OK")
</pallas_src>

<mosaic_0001>
module attributes {stable_mosaic.version = 11 : i64} {
  func.func @_feature_head_kernel(%arg0: i32, %arg1: i32, %arg2: memref<4x256xbf16, #tpu.memory_space<vmem>>, %arg3: memref<256x128xbf16, #tpu.memory_space<vmem>>, %arg4: memref<1x128xf32, #tpu.memory_space<vmem>>, %arg5: memref<4x128xf32, #tpu.memory_space<vmem>>, %arg6: memref<128x128xbf16, #tpu.memory_space<vmem>>, %arg7: memref<1x128xf32, #tpu.memory_space<vmem>>, %arg8: memref<4x128xf32, #tpu.memory_space<vmem>>, %arg9: memref<4x128xf32, #tpu.memory_space<vmem>>, %arg10: memref<4x128xf32, #tpu.memory_space<vmem>>) attributes {dimension_semantics = [#tpu.dimension_semantics<parallel>, #tpu.dimension_semantics<arbitrary>], iteration_bounds = array<i64: 1, 1>, scalar_prefetch = 0 : i64, scratch_operands = 1 : i64, tpu.core_type = #tpu.core_type<tc>, window_params = [{transform_indices = @transform_0, window_bounds = array<i64: 4, 256>}, {transform_indices = @transform_1, window_bounds = array<i64: 256, 128>}, {pipeline_mode = #tpu.pipeline_mode<synchronous>, transform_indices = @transform_2, window_bounds = array<i64: 1, 128>}, {transform_indices = @transform_3, window_bounds = array<i64: 4, 128>}, {pipeline_mode = #tpu.pipeline_mode<synchronous>, transform_indices = @transform_4, window_bounds = array<i64: 128, 128>}, {pipeline_mode = #tpu.pipeline_mode<synchronous>, transform_indices = @transform_5, window_bounds = array<i64: 1, 128>}, {transform_indices = @transform_6, window_bounds = array<i64: 4, 128>}, {transform_indices = @transform_7, window_bounds = array<i64: 4, 128>}]} {
    %c0_i32 = arith.constant 0 : i32
    %0 = arith.cmpi eq, %arg1, %c0_i32 : i32
    %1 = arith.extui %0 : i1 to i32
    %c0_i32_0 = arith.constant 0 : i32
    %2 = arith.cmpi ne, %1, %c0_i32_0 : i32
    scf.if %2 {
      %cst_10 = arith.constant 0.000000e+00 : f32
      %12 = vector.broadcast %cst_10 : f32 to vector<4x128xf32>
      %c0_11 = arith.constant 0 : index
      %c0_12 = arith.constant 0 : index
      %13 = vector.load %arg10[%c0_11, %c0_12] : memref<4x128xf32, #tpu.memory_space<vmem>>, vector<4x128xf32>
      tpu.vector_store %arg10[%c0_11, %c0_12], %12 {strides = array<i32>} : memref<4x128xf32, #tpu.memory_space<vmem>>, vector<4x128xf32>,
    } else {
    }
    %c0 = arith.constant 0 : index
    %c0_1 = arith.constant 0 : index
    %3 = vector.load %arg10[%c0, %c0_1] : memref<4x128xf32, #tpu.memory_space<vmem>>, vector<4x128xf32>
    %c0_2 = arith.constant 0 : index
    %c0_3 = arith.constant 0 : index
    %4 = vector.load %arg2[%c0_2, %c0_3] : memref<4x256xbf16, #tpu.memory_space<vmem>>, vector<4x256xbf16>
    %c0_4 = arith.constant 0 : index
    %c0_5 = arith.constant 0 : index
    %5 = vector.load %arg3[%c0_4, %c0_5] : memref<256x128xbf16, #tpu.memory_space<vmem>>, vector<256x128xbf16>
    %cst = arith.constant dense<0.000000e+00> : vector<4x128xf32>
    %6 = tpu.matmul %4, %5, %cst {dimension_numbers = #tpu.dot_dimension_numbers<[1], [0], [0], [1], [0, 0, 1, 1], [], []>} : vector<4x256xbf16>, vector<256x128xbf16>, vector<4x128xf32> -> vector<4x128xf32>
    %7 = arith.addf %3, %6 : vector<4x128xf32>
    %c0_6 = arith.constant 0 : index
    %c0_7 = arith.constant 0 : index
    %8 = vector.load %arg10[%c0_6, %c0_7] : memref<4x128xf32, #tpu.memory_space<vmem>>, vector<4x128xf32>
    tpu.vector_store %arg10[%c0_6, %c0_7], %7 {strides = array<i32>} : memref<4x128xf32, #tpu.memory_space<vmem>>, vector<4x128xf32>,
    %c0_i32_8 = arith.constant 0 : i32
    %9 = arith.cmpi eq, %arg1, %c0_i32_8 : i32
    %10 = arith.extui %9 : i1 to i32
    %c0_i32_9 = arith.constant 0 : i32
    %11 = arith.cmpi ne, %10, %c0_i32_9 : i32
    scf.if %11 {
      %c0_10 = arith.constant 0 : index
      %c0_11 = arith.constant 0 : index
      %12 = vector.load %arg10[%c0_10, %c0_11] : memref<4x128xf32, #tpu.memory_space<vmem>>, vector<4x128xf32>
      %c0_12 = arith.constant 0 : index
      %c0_13 = arith.constant 0 : index
      %13 = vector.load %arg4[%c0_12, %c0_13] : memref<1x128xf32, #tpu.memory_space<vmem>>, vector<1x128xf32>
      %14 = vector.broadcast %13 : vector<1x128xf32> to vector<4x128xf32>
      %15 = arith.addf %12, %14 : vector<4x128xf32>
      %c0_14 = arith.constant 0 : index
      %c0_15 = arith.constant 0 : index
      %16 = vector.load %arg5[%c0_14, %c0_15] : memref<4x128xf32, #tpu.memory_space<vmem>>, vector<4x128xf32>
      %17 = arith.mulf %15, %16 : vector<4x128xf32>
      %cst_16 = arith.constant 0.000000e+00 : f32
      %18 = vector.broadcast %cst_16 : f32 to vector<4x128xf32>
      %19 = arith.maximumf %17, %18 : vector<4x128xf32>
      %20 = arith.truncf %19 : vector<4x128xf32> to vector<4x128xbf16>
      %c0_17 = arith.constant 0 : index
      %c0_18 = arith.constant 0 : index
      %21 = vector.load %arg6[%c0_17, %c0_18] : memref<128x128xbf16, #tpu.memory_space<vmem>>, vector<128x128xbf16>
      %cst_19 = arith.constant dense<0.000000e+00> : vector<4x128xf32>
      %22 = tpu.matmul %20, %21, %cst_19 {dimension_numbers = #tpu.dot_dimension_numbers<[1], [0], [0], [1], [0, 0, 1, 1], [], []>} : vector<4x128xbf16>, vector<128x128xbf16>, vector<4x128xf32> -> vector<4x128xf32>
      %c0_20 = arith.constant 0 : index
      %c0_21 = arith.constant 0 : index
      %23 = vector.load %arg7[%c0_20, %c0_21] : memref<1x128xf32, #tpu.memory_space<vmem>>, vector<1x128xf32>
      %24 = vector.broadcast %23 : vector<1x128xf32> to vector<4x128xf32>
      %25 = arith.addf %22, %24 : vector<4x128xf32>
      %c0_22 = arith.constant 0 : index
      %c0_23 = arith.constant 0 : index
      %26 = vector.load %arg8[%c0_22, %c0_23] : memref<4x128xf32, #tpu.memory_space<vmem>>, vector<4x128xf32>
      %27 = arith.mulf %25, %26 : vector<4x128xf32>
      %cst_24 = arith.constant 0.000000e+00 : f32
      %28 = vector.broadcast %cst_24 : f32 to vector<4x128xf32>
      %29 = arith.maximumf %27, %28 : vector<4x128xf32>
      %c0_25 = arith.constant 0 : index
      %c0_26 = arith.constant 0 : index
      %30 = vector.load %arg9[%c0_25, %c0_26] : memref<4x128xf32, #tpu.memory_space<vmem>>, vector<4x128xf32>
      tpu.vector_store %arg9[%c0_25, %c0_26], %29 {strides = array<i32>} : memref<4x128xf32, #tpu.memory_space<vmem>>, vector<4x128xf32>,
    } else {
    }
    return
  }
  func.func @transform_0(%arg0: i32, %arg1: i32) -> (i32, i32) {
    %c0_i32 = arith.constant 0 : i32
    return %arg0, %arg1 : i32, i32
  }
  func.func @transform_1(%arg0: i32, %arg1: i32) -> (i32, i32) {
    %c0_i32 = arith.constant 0 : i32
    %c0_i32_0 = arith.constant 0 : i32
    return %arg1, %c0_i32 : i32, i32
  }
  func.func @transform_2(%arg0: i32, %arg1: i32) -> (i32, i32) {
    %c0_i32 = arith.constant 0 : i32
    %c0_i32_0 = arith.constant 0 : i32
    %c0_i32_1 = arith.constant 0 : i32
    return %c0_i32, %c0_i32_0 : i32, i32
  }
  func.func @transform_3(%arg0: i32, %arg1: i32) -> (i32, i32) {
    %c0_i32 = arith.constant 0 : i32
    %c0_i32_0 = arith.constant 0 : i32
    return %arg0, %c0_i32 : i32, i32
  }
  func.func @transform_4(%arg0: i32, %arg1: i32) -> (i32, i32) {
    %c0_i32 = arith.constant 0 : i32
    %c0_i32_0 = arith.constant 0 : i32
    %c0_i32_1 = arith.constant 0 : i32
    return %c0_i32, %c0_i32_0 : i32, i32
  }
  func.func @transform_5(%arg0: i32, %arg1: i32) -> (i32, i32) {
    %c0_i32 = arith.constant 0 : i32
    %c0_i32_0 = arith.constant 0 : i32
    %c0_i32_1 = arith.constant 0 : i32
    return %c0_i32, %c0_i32_0 : i32, i32
  }
  func.func @transform_6(%arg0: i32, %arg1: i32) -> (i32, i32) {
    %c0_i32 = arith.constant 0 : i32
    %c0_i32_0 = arith.constant 0 : i32
    return %arg0, %c0_i32 : i32, i32
  }
  func.func @transform_7(%arg0: i32, %arg1: i32) -> (i32, i32) {
    %c0_i32 = arith.constant 0 : i32
    %c0_i32_0 = arith.constant 0 : i32
    return %arg0, %c0_i32 : i32, i32
  }
}

</mosaic_0001>

<bundles_post_ra>
// kernel: tpu_custom_call.1
= control target key start
LH: loop header
LB: loop body
LE: loop exit
PB: predicated region body
PF: predicated region fallthrough
CT: control target
= control target key end

     0   :  { %12 = vsyncpa [#allocation4], 0  ;;  %s720_s0 = inlined_call_operand.hbm [shape: bf16[4,256], index: 0, kind: input, shape index: {}]   ;;  %s721_s1 = inlined_call_operand.hbm [shape: bf16[256,128], index: 1, kind: input, shape index: {}]   ;;  %s722_s2 = inlined_call_operand.vmem [shape: f32[1,128], index: 2, kind: input, shape index: {}]   ;;  %s723_s3 = inlined_call_operand.vmem [shape: f32[4,128], index: 3, kind: input, shape index: {}]   ;;  %s724_s4 = inlined_call_operand.hbm [shape: bf16[128,128], index: 4, kind: input, shape index: {}]   ;;  %s725_s5 = inlined_call_operand.vmem [shape: f32[1,128], index: 5, kind: input, shape index: {}]   ;;  %s726_s6 = inlined_call_operand.vmem [shape: f32[4,128], index: 6, kind: input, shape index: {}]   ;;  %s727_s7 = inlined_call_operand.hbm [shape: f32[4,128], index: 7, kind: output, shape index: {}]  }
   0x1   :  { %13 = vsyncpa [#allocation7], 0 }
   0x2   :  { %14 = vsyncpa [#allocation5], 0  ;;  %s606_s24 = smov [#allocation6]   ;;  %s512_s28 = scalar_lea.hbm %s721_s1, 2048 }
   0x3   :  { %s30_s25 = sshll.u32 %s606_s24, 4  ;;  %p513_p0 = scmp.ne.s32.totalorder %s721_s1, %s512_s28  ;;  %s31_s25 = int_to_ptr.vmem [resolvable:$true] %s30_s25 }
   0x4   :  { %p516_p1 = scmp.lt.u32.totalorder %s512_s28, %s721_s1 }
   0x6   :  { %p518_p2 = pnand %p516_p1, %p513_p0 }
   0x8   :  { %521 = shalt.err (!%p518_p2)
}
   0x9   :  { %s522_s10 = scalar_lea.vmem %s31_s25, 2048  ;;  %p527_p4 = scmp.lt.s32.totalorder %s31_s25, %s31_s25 }
   0xa   :  { %p523_p3 = scmp.ne.s32.totalorder %s31_s25, %s522_s10  ;;  %p528_p5 = scmp.lt.s32.totalorder %s522_s10, %s522_s10 }
   0xc   :  { %p529_p6 = por %p528_p5, %p527_p4 }
   0xe   :  { %p530_p7 = pnand %p529_p6, %p523_p3 }
  0x10   :  { %533 = shalt.err (!%p530_p7)
}
  0x11   :  { %s607_s11 = smov 64   ;;  %s608_s12 = smov 4  }
  0x12   :  { %36 = dma.hbm_to_vmem [thread:$0]  %s721_s1, 2048, %s31_s25, [#allocation7], %s607_s11, %s607_s11, %s608_s12  }
  0x13   :  { %s609_s15 = smov [#allocation3]   ;;  %s610_s17 = smov [#allocation8]  }
  0x14   :  { %s21_s16 = sshll.u32 %s609_s15, 4  ;;  %s46_s18 = sshll.u32 %s610_s17, 4  ;;  %s22_s16 = int_to_ptr.vmem [resolvable:$true] %s21_s16  ;;  %s47_s18 = int_to_ptr.vmem [resolvable:$true] %s46_s18 }
  0x15   :  { %s534_s21 = scalar_lea.hbm %s720_s0, 64 }
  0x16   :  { %p535_p8 = scmp.ne.s32.totalorder %s720_s0, %s534_s21  ;;  %p538_p9 = scmp.lt.u32.totalorder %s534_s21, %s720_s0 }
  0x18   :  { %p540_p10 = pnand %p538_p9, %p535_p8 }
  0x1a   :  { %543 = shalt.err (!%p540_p10)
}
  0x1b   :  { %s544_s1 = scalar_lea.vmem %s22_s16, 64  ;;  %p549_p12 = scmp.lt.s32.totalorder %s22_s16, %s22_s16 }
  0x1c   :  { %p545_p11 = scmp.ne.s32.totalorder %s22_s16, %s544_s1  ;;  %p550_p13 = scmp.lt.s32.totalorder %s544_s1, %s544_s1 }
  0x1e   :  { %p551_p0 = por %p550_p13, %p549_p12 }
  0x20   :  { %p552_p1 = pnand %p551_p0, %p545_p11 }
  0x22   :  { %555 = shalt.err (!%p552_p1)
}
  0x23   :  { %24 = dma.hbm_to_vmem [thread:$0]  %s720_s0, 64, %s22_s16, [#allocation4]  }
  0x24   :  { %s556_s30 = scalar_lea.hbm %s724_s4, 1024 }
  0x25   :  { %p557_p2 = scmp.ne.s32.totalorder %s724_s4, %s556_s30  ;;  %p560_p3 = scmp.lt.u32.totalorder %s556_s30, %s724_s4 }
  0x27   :  { %p562_p4 = pnand %p560_p3, %p557_p2 }
  0x29   :  { %565 = shalt.err (!%p562_p4)
}
  0x2a   :  { %s566_s14 = scalar_lea.vmem %s47_s18, 1024  ;;  %p571_p6 = scmp.lt.s32.totalorder %s47_s18, %s47_s18 }
  0x2b   :  { %p567_p5 = scmp.ne.s32.totalorder %s47_s18, %s566_s14  ;;  %p572_p7 = scmp.lt.s32.totalorder %s566_s14, %s566_s14 }
  0x2d   :  { %p573_p8 = por %p572_p7, %p571_p6 }
  0x2f   :  { %p574_p9 = pnand %p573_p8, %p567_p5 }
  0x31   :  { %577 = shalt.err (!%p574_p9)
}
  0x32   :  { %52 = dma.hbm_to_vmem [thread:$0]  %s724_s4, 1024, %s47_s18, [#allocation7], %s607_s11, %s607_s11, %s608_s12  }
  0x33   :  { %600 = dma.done.wait [#allocation4], 64  }
  0x34   :  { %601 = vsyncadd [#allocation4], 4294967232 }
  0x35   :  { %602 = dma.done.wait [#allocation7], 3072  }
  0x36   :  { %603 = vsyncadd [#allocation7], 4294964224  ;;  %v611_v0 = vmov 0.0   ;;  %v488_v1 = vld [vmem:[#allocation6 + $0x40] sm:$0xff]   ;;  %v490_v3 = vld [vmem:[#allocation6 + $0x48] sm:$0xff]   ;;  %vm612_vm0 = vmmov 0  }
  0x37   :  { %460 = vmatprep.subr.bf16.mxu1 %v611_v0  ;;  %71 = vst [vmem:[#allocation2] sm:$0xf] %v611_v0  ;;  %v489_v2 = vld [vmem:[#allocation6] sm:$0xff]   ;;  %429 = vmatprep.subr.bf16.mxu0 %v488_v1  ;;  %v491_v4 = vld [vmem:[#allocation6 + $0x8] sm:$0xff]   ;;  %v492_v5 = vld [vmem:[#allocation6 + $0x50] sm:$0xff]  }
  0x38   :  { %430 = vmatpush3.bf16.msra.mxu0 %v489_v2  ;;  %v493_v6 = vld [vmem:[#allocation6 + $0x10] sm:$0xff]   ;;  %v494_v7 = vld [vmem:[#allocation6 + $0x58] sm:$0xff]   ;;  %v496_v9 = vld [vmem:[#allocation6 + $0x60] sm:$0xff]   ;;  %476 = vmatprep.mubr.msk.bf16.mxu1 %vm612_vm0, %v611_v0 }
  0x39   :  { %431 = vmatprep.subr.bf16.mxu0 %v490_v3  ;;  %v495_v8 = vld [vmem:[#allocation6 + $0x18] sm:$0xff]   ;;  %v497_v10 = vld [vmem:[#allocation6 + $0x20] sm:$0xff]   ;;  %v498_v11 = vld [vmem:[#allocation6 + $0x68] sm:$0xff]  }
  0x3a   :  { %v402_v12 = vld.sshfl [vmem:[#allocation3] sm:$0x33 pattern:$0x76325410]  ;;  %v499_v13 = vld [vmem:[#allocation6 + $0x28] sm:$0xff]   ;;  %v504_v15 = vld [vmem:[#allocation8] sm:$0xff]  }
  0x3b   :  { %v114_v14 = vcombine.high %v402_v12, %v402_v12  ;;  %v500_v16 = vld [vmem:[#allocation6 + $0x70] sm:$0xff]   ;;  %v505_v17 = vld [vmem:[#allocation8 + $0x8] sm:$0xff]   ;;  %461 = vmatpush3.bf16.msra.mxu1 %v504_v15  ;;  %v502_v19 = vld [vmem:[#allocation6 + $0x78] sm:$0xff]  }
  0x3c   :  { %432 = vmatpush3.bf16.msra.mxu0 %v491_v4  ;;  %462 = vmatprep.subr.bf16.mxu1 %v611_v0  ;;  %v501_v18 = vld [vmem:[#allocation6 + $0x30] sm:$0xff]   ;;  %v503_v21 = vld [vmem:[#allocation6 + $0x38] sm:$0xff]   ;;  %v508_v23 = vld [vmem:[#allocation8 + $0x20] sm:$0xff]  }
  0x3d   :  { %433 = vmatprep.subr.bf16.mxu0 %v492_v5  ;;  %245 = vmatprep.mubr.bf16.mxu0 %v114_v14  ;;  %v506_v20 = vld [vmem:[#allocation8 + $0x10] sm:$0xff]   ;;  %v507_v22 = vld [vmem:[#allocation8 + $0x18] sm:$0xff]   ;;  %v509_v24 = vld [vmem:[#allocation8 + $0x28] sm:$0xff]  }
  0x3e   :  { %v510_v25 = vld [vmem:[#allocation8 + $0x30] sm:$0xff]   ;;  %v511_v26 = vld [vmem:[#allocation8 + $0x38] sm:$0xff]  }
  0x3f   :  { %463 = vmatpush3.bf16.msra.mxu1 %v505_v17  ;;  %v72_v28 = vld [vmem:[#allocation2] sm:$0xf] }
  0x40   :  { %434 = vmatpush3.bf16.msra.mxu0 %v493_v6  ;;  %464 = vmatprep.subr.bf16.mxu1 %v611_v0  ;;  %v419_v34 = vld [vmem:[%s722_s2] ss:$0 sm:$0xff]  ;;  %s613_s2 = smov [#allocation9]  }
  0x41   :  { %435 = vmatprep.subr.bf16.mxu0 %v494_v7  ;;  %v267_v36 = vld [vmem:[%s723_s3] sm:$0xf]  ;;  %s392_s21 = sshll.u32 %s613_s2, 4  ;;  %s393_s21 = int_to_ptr.vmem [resolvable:$true] %s392_s21 }
  0x42   :  { %v420_v41 = vld [vmem:[%s725_s5] ss:$0 sm:$0xff]  ;;  %s578_s3 = scalar_lea.vmem %s393_s21, 64  ;;  %p583_p11 = scmp.lt.s32.totalorder %s393_s21, %s393_s21 }
  0x43   :  { %465 = vmatpush3.bf16.msra.mxu1 %v506_v20  ;;  %v382_v43 = vld [vmem:[%s726_s6] sm:$0xf]  ;;  %p579_p10 = scmp.ne.s32.totalorder %s393_s21, %s578_s3  ;;  %p584_p12 = scmp.lt.s32.totalorder %s578_s3, %s578_s3 }
  0x44   :  { %436 = vmatpush3.bf16.msra.mxu0 %v495_v8  ;;  %466 = vmatprep.subr.bf16.mxu1 %v611_v0 }
  0x45   :  { %437 = vmatprep.subr.bf16.mxu0 %v496_v9  ;;  %p585_p13 = por %p584_p12, %p583_p11 }
  0x47   :  { %467 = vmatpush3.bf16.msra.mxu1 %v507_v22  ;;  %p586_p0 = pnand %p585_p13, %p579_p10 }
  0x48   :  { %438 = vmatpush3.bf16.msra.mxu0 %v497_v10  ;;  %468 = vmatprep.subr.bf16.mxu1 %v611_v0 }
  0x49   :  { %439 = vmatprep.subr.bf16.mxu0 %v498_v11 }
  0x4b   :  { %469 = vmatpush3.bf16.msra.mxu1 %v508_v23 }
  0x4c   :  { %440 = vmatpush3.bf16.msra.mxu0 %v499_v13  ;;  %470 = vmatprep.subr.bf16.mxu1 %v611_v0 }
  0x4d   :  { %441 = vmatprep.subr.bf16.mxu0 %v500_v16 }
  0x4f   :  { %471 = vmatpush3.bf16.msra.mxu1 %v509_v24 }
  0x50   :  { %442 = vmatpush3.bf16.msra.mxu0 %v501_v18  ;;  %472 = vmatprep.subr.bf16.mxu1 %v611_v0 }
  0x51   :  { %443 = vmatprep.subr.bf16.mxu0 %v502_v19 }
  0x53   :  { %473 = vmatpush3.bf16.msra.mxu1 %v510_v25 }
  0x54   :  { %444 = vmatpush3.bf16.msra.mxu0 %v503_v21  ;;  %474 = vmatprep.subr.bf16.mxu1 %v611_v0 }
  0x57   :  { %246 = vmatmul.mubr.bf16.vlgmr.msra.gmra.mrb[0].mxu0 %v402_v12  ;;  %475 = vmatpush3.bf16.msra.mxu1 %v511_v26 }
 0x12a   :  { %v445_v27 = vpop.f32.mrb[0].mxu0 }
 0x12b   :  { %v446_v29 = vpop.f32.mrb[1].mxu0 }
 0x12c   :  { %v447_v30 = vadd.f32 %v446_v29, %v445_v27  ;;  %v448_v31 = vpop.f32.mrb[2].mxu0 }
 0x12d   :  { %v449_v32 = vpop.f32.mrb[3].mxu0 }
 0x12e   :  { %v253_v33 = vadd.f32 %v447_v30, %v72_v28 }
 0x130   :  { %254 = vst [vmem:[#allocation2] sm:$0xf] %v253_v33 }
 0x137   :  { %v258_v35 = vld [vmem:[#allocation2] sm:$0xf] }
 0x138   :  { %v266_v37 = vadd.f32 %v419_v34, %v258_v35 }
 0x13a   :  { %v268_v38 = vmul.f32 %v267_v36, %v266_v37 }
 0x13c   :  { %v269_v39 = vmax.f32 %v268_v38, 0.0 }
 0x13e   :  { %v270_v40 = vpack.c.bf16 %v269_v39, %v269_v39 }
 0x140   :  { %477 = vmatmul.mubr.bf16.vlgmr.msra.gmra.mrb[0].mxu1 %v270_v40 }
 0x213   :  { %v376_v42 = vpop.f32.mrb[0].mxu1 }
 0x214   :  { %v377_v44 = vadd.f32 %v420_v41, %v376_v42  ;;  %v478_v45 = vpop.f32.mrb[1].mxu1 }
 0x215   :  { %v379_v46 = vpop.f32.mrb[2].mxu1 }
 0x216   :  { %v383_v47 = vmul.f32 %v382_v43, %v377_v44  ;;  %v479_v48 = vpop.f32.mrb[3].mxu1 }
 0x218   :  { %v384_v49 = vmax.f32 %v383_v47, 0.0 }
 0x21a   :  { %385 = vst [vmem:[#allocation9] sm:$0xf] %v384_v49 }
 0x21b   :  { %589 = shalt.err (!%p586_p0)
}
 0x21c   :  { %s590_s6 = scalar_lea.hbm %s727_s7, 64 }
 0x21d   :  { %p591_p1 = scmp.ne.s32.totalorder %s727_s7, %s590_s6  ;;  %p594_p2 = scmp.lt.u32.totalorder %s590_s6, %s727_s7 }
 0x21f   :  { %p596_p3 = pnand %p594_p2, %p591_p1 }
 0x221   :  { %599 = shalt.err (!%p596_p3)
}
 0x222   :  { %395 = dma.vmem_to_hbm [thread:$0]  %s393_s21, 64, %s727_s7, [#allocation5]  }
 0x223   :  { %604 = dma.done.wait [#allocation5], 64  }
 0x224   :  { %605 = vsyncadd [#allocation5], 4294967232 }
 0x225   :  { %399 = vsyncpa [#allocation4], 1 }
 0x226   :  { %400 = vsyncpa [#allocation7], 1 }
 0x227   :  { %401 = vsyncpa [#allocation5], 1 }

</bundles_post_ra>
